<compile_context>
chip_gen: v5e
topology: v5e:2x2
jax: 0.10.0
libtpu: 0.0.40
codegen_flags: <defaults>
</compile_context>

<pallas_src>
import jax
import jax.numpy as jnp
from jax import lax
from jax.experimental import pallas as pl
from jax.experimental.pallas import tpu as pltpu

# ---- small synthetic config (stands in for hidden_dim=5120, voc_size=32000) ----
B, S, H, NH, F, V = 2, 8, 128, 4, 256, 512
BS = B * S                 # 16 flattened rows
DH = H // NH               # 32
HALF = DH // 2             # 16
TV = 256                   # vocab tile: >=256 to fill the 256-wide MXU on v6e/v7x
G = 8                      # embedding rows gathered per grid step
RMS_EPS = 1e-6


def _vmem_limit_bytes():
    # Per-generation scoped-VMEM budget (v7x: 64 MiB physical vs 128 MiB on v5e/v6e).
    try:
        cap = pltpu.get_tpu_info().vmem_capacity_bytes
        return int(min(cap // 2, 64 * 1024 * 1024))
    except Exception:
        return 32 * 1024 * 1024


# ============================ embedding gather ============================

def _gather_kernel(ids_ref, table_ref, o_ref, sem):
    # G rows per grid step: amortizes grid overhead / DMA descriptors and gives
    # an 8-sublane, lane-dense output block.
    base = pl.program_id(0) * G
    for g in range(G):                                   # static unroll
        pltpu.make_async_copy(table_ref.at[ids_ref[base + g]],
                              o_ref.at[g], sem.at[g]).start()
    for g in range(G):
        pltpu.make_async_copy(table_ref.at[ids_ref[base + g]],
                              o_ref.at[g], sem.at[g]).wait()


def pallas_embed(ids_flat, table):
    """Batched row-gather from the HBM embedding table (manual DMA)."""
    # TODO(synk): a bf16/fp16 production table would gather >=2 packed rows per DMA.
    n = ids_flat.shape[0]
    h = table.shape[-1]
    return pl.pallas_call(
        _gather_kernel,
        out_shape=jax.ShapeDtypeStruct((n, h), table.dtype),
        grid_spec=pltpu.PrefetchScalarGridSpec(
            num_scalar_prefetch=1,
            grid=(n // G,),
            in_specs=[pl.BlockSpec(memory_space=pl.ANY)],       # table stays in HBM
            out_specs=pl.BlockSpec((G, h), lambda i, ids: (i, 0)),
            scratch_shapes=[pltpu.SemaphoreType.DMA((G,))]),
        compiler_params=pltpu.CompilerParams(
            dimension_semantics=("arbitrary",),
            vmem_limit_bytes=_vmem_limit_bytes()),
    )(ids_flat, table)


# ============================ fused decoder layer ============================

def _decoder_layer_kernel(x_ref, mask_ref, cosf_ref, sina_ref, sinb_ref,
                          ln1_ref, wqkv_ref, wo_ref,
                          ln2_ref, wgu_ref, wd_ref, lnf_ref,
                          xf_ref):
    f32, bf16 = jnp.float32, jnp.bfloat16
    x = x_ref[...].astype(f32)                           # (BS, H) residual stream

    def rms(t, w_row):
        var = jnp.mean(t * t, axis=-1, keepdims=True)
        return t * lax.rsqrt(var + RMS_EPS) * w_row

    # ---------------- attention block ----------------
    xn = rms(x, ln1_ref[...])
    # fused QKV projection: one MXU pass over all B*S rows
    qkv = jnp.dot(xn.astype(bf16), wqkv_ref[...], preferred_element_type=f32)  # (BS, 3H)
    q, k, v = qkv[:, :H], qkv[:, H:2 * H], qkv[:, 2 * H:]

    # RoPE (Llama rotate_half) with NO lane slicing/concat: two XLU rolls of the
    # full (BS, H) row + sign/zero-folded sin tables built in the glue.
    def rope(t):
        return (t * cosf_ref[...]
                + pltpu.roll(t, H - HALF, axis=1) * sina_ref[...]   # t[:, i + HALF]
                + pltpu.roll(t, HALF, axis=1) * sinb_ref[...])      # t[:, i - HALF]

    q = rope(q)
    k = rope(k)

    # Additive bias on the flattened (BS, BS) token grid: same-batch (block
    # diagonal) AND causal AND key-not-padding.  Fully-masked rows degrade to a
    # uniform softmax, which is harmless since those positions carry label -100.
    q_tok = lax.broadcasted_iota(jnp.int32, (BS, BS), 0)
    k_tok = lax.broadcasted_iota(jnp.int32, (BS, BS), 1)
    allowed = ((q_tok // S == k_tok // S) & (k_tok <= q_tok)
               & (mask_ref[...] > 0.0))
    bias = jnp.where(allowed, 0.0, -1e9)

    # TODO(synk): replace the dense (BS, BS) softmax with flash-style KV tiling
    # (online softmax per KV tile) for production S.
    scale = 1.0 / (DH ** 0.5)
    for hh in range(NH):                                 # static unroll, NH small
        lo = hh * DH
        q_h, k_h, v_h = q[:, lo:lo + DH], k[:, lo:lo + DH], v[:, lo:lo + DH]
        s_h = (jnp.dot(q_h.astype(bf16), k_h.astype(bf16).T,
                       preferred_element_type=f32) * scale + bias)
        m_h = jnp.max(s_h, axis=-1, keepdims=True)
        p_h = jnp.exp(s_h - m_h)
        # approx EUP reciprocal: ~1e-3 deviation vs exact softmax (acceptable here)
        p_h = p_h * pl.reciprocal(jnp.sum(p_h, axis=-1, keepdims=True), approx=True)
        av_h = jnp.dot(p_h.astype(bf16), v_h.astype(bf16), preferred_element_type=f32)
        # per-head o_proj accumulated straight into the residual: no lane concat
        x = x + jnp.dot(av_h.astype(bf16), wo_ref[lo:lo + DH, :],
                        preferred_element_type=f32)

    # ---------------- MLP block (SwiGLU, fused gate+up) ----------------
    hn = rms(x, ln2_ref[...])
    gu = jnp.dot(hn.astype(bf16), wgu_ref[...], preferred_element_type=f32)    # (BS, 2F)
    g, u = gu[:, :F], gu[:, F:]
    x = x + jnp.dot((g * jax.nn.sigmoid(g) * u).astype(bf16), wd_ref[...],
                    preferred_element_type=f32)

    # final RMSNorm fused here (single-layer synthetic model); emitted in bf16
    # so the head kernel streams half the bytes and gets its MXU input dtype.
    xf_ref[...] = rms(x, lnf_ref[...]).astype(bf16)


def _full_spec(shape):
    nd = len(shape)
    return pl.BlockSpec(shape, lambda i, _nd=nd: (0,) * _nd)


def pallas_decoder_layer(x, mask_flat, cosf, sina, sinb, p):
    return pl.pallas_call(
        _decoder_layer_kernel,
        out_shape=jax.ShapeDtypeStruct((BS, H), jnp.bfloat16),
        grid=(1,),                                        # batch folded into one block
        in_specs=[
            _full_spec((BS, H)),                          # x
            _full_spec((1, BS)),                          # flattened padding mask
            _full_spec((BS, H)), _full_spec((BS, H)), _full_spec((BS, H)),  # cos/sinA/sinB
            _full_spec((1, H)), _full_spec((H, 3 * H)), _full_spec((H, H)),  # ln1, wqkv, wo
            _full_spec((1, H)), _full_spec((H, 2 * F)), _full_spec((F, H)),  # ln2, wgu, wd
            _full_spec((1, H)),                           # lnf
        ],
        out_specs=_full_spec((BS, H)),
        compiler_params=pltpu.CompilerParams(
            dimension_semantics=("arbitrary",),
            vmem_limit_bytes=_vmem_limit_bytes()),
    )(x, mask_flat, cosf, sina, sinb,
      p['ln1'], p['wqkv'], p['wo'],
      p['ln2'], p['wgu'], p['wd'], p['lnf'])


# ================= fused LM head + cross-entropy / accuracy =================

def _head_loss_kernel(xf_ref, w_ref, tgt_ref, srw_ref,
                      acc_ref, hf_ref, lreg_ref,
                      m_sc, d_sc, pick_sc, bv_sc, bi_sc):
    j = pl.program_id(0)
    v0 = j * TV

    @pl.when(j == 0)
    def _():
        m_sc[...] = jnp.full_like(m_sc, -jnp.inf)
        d_sc[...] = jnp.zeros_like(d_sc)
        pick_sc[...] = jnp.zeros_like(pick_sc)
        bv_sc[...] = jnp.full_like(bv_sc, -jnp.inf)
        bi_sc[...] = jnp.zeros_like(bi_sc)

    tgt = tgt_ref[...]                                   # (BS, 1) int32, -100 = ignore
    # logits tile (BS, TV): ONE 2-D matmul over all rows; the (TV, H) weight
    # tile is a contiguous row slab of the transposed lm_head.
    logits = lax.dot_general(xf_ref[...], w_ref[...],
                             dimension_numbers=(((1,), (1,)), ((), ())),
                             preferred_element_type=jnp.float32)

    # ---- online logsumexp ----
    tile_max = jnp.max(logits, axis=-1, keepdims=True)   # (BS, 1)
    new_m = jnp.maximum(m_sc[...], tile_max)
    d_sc[...] = (d_sc[...] * jnp.exp(m_sc[...] - new_m)
                 + jnp.sum(jnp.exp(logits - new_m), axis=-1, keepdims=True))
    m_sc[...] = new_m

    # ---- picked (target) logit ----
    iota_v = lax.broadcasted_iota(jnp.int32, logits.shape, 1)
    pick_sc[...] += jnp.sum(jnp.where(iota_v == tgt - v0, logits, 0.0),
                            axis=-1, keepdims=True)

    # ---- online argmax (first-occurrence tie-break, like torch.argmax) ----
    cand = jnp.where(logits >= tile_max, iota_v, TV)
    tile_arg = v0 + jnp.min(cand, axis=-1, keepdims=True)
    better = tile_max > bv_sc[...]
    bi_sc[...] = jnp.where(better, tile_arg, bi_sc[...])
    bv_sc[...] = jnp.where(better, tile_max, bv_sc[...])

    @pl.when(j == pl.num_programs(0) - 1)
    def _():
        lse = m_sc[...] + jnp.log(d_sc[...])
        valid = tgt != -100
        per_tok = jnp.where(valid, lse - pick_sc[...], 0.0)     # CE, ignore_index=-100
        srw = srw_ref[...]
        # reweighted loss: computed (as in the reference) but the module returns
        # output['loss'] (HF-internal mean CE), so this value is unused upstream.
        lreg_ref[0, 0] = jnp.sum(srw * per_tok) / jnp.sum(srw)
        hf_ref[0, 0] = jnp.sum(per_tok) / jnp.sum(valid.astype(jnp.float32))
        # accuracy: rows where every token is predicted correctly or ignored
        ok = jnp.where(jnp.logical_or(bi_sc[...] == tgt, tgt == -100), 1.0, 0.0)
        row_ok = jnp.min(ok.reshape(B, S), axis=-1)             # all() per batch row
        acc_ref[0, 0] = jnp.sum(row_ok) / jnp.float32(B)


def pallas_head_and_loss(xf, w_head_t, target, srw):
    bs, h = xf.shape
    v = w_head_t.shape[0]
    smem_scalar = pl.BlockSpec((1, 1), lambda j: (0, 0),
                               memory_space=pltpu.MemorySpace.SMEM)
    outs = pl.pallas_call(
        _head_loss_kernel,
        out_shape=(jax.ShapeDtypeStruct((1, 1), jnp.float32),) * 3,
        grid=(v // TV,),
        in_specs=[
            pl.BlockSpec((bs, h), lambda j: (0, 0)),      # xf (bf16, resident)
            pl.BlockSpec((TV, h), lambda j: (j, 0)),      # contiguous lm_head row tile
            pl.BlockSpec((bs, 1), lambda j: (0, 0)),      # shifted labels
            pl.BlockSpec((bs, 1), lambda j: (0, 0)),      # shifted reweights
        ],
        out_specs=(smem_scalar,) * 3,
        scratch_shapes=[
            pltpu.VMEM((bs, 1), jnp.float32),   # running max
            pltpu.VMEM((bs, 1), jnp.float32),   # running sum-exp
            pltpu.VMEM((bs, 1), jnp.float32),   # picked logit
            pltpu.VMEM((bs, 1), jnp.float32),   # best logit value
            pltpu.VMEM((bs, 1), jnp.int32),     # best logit index
        ],
        compiler_params=pltpu.CompilerParams(
            dimension_semantics=("arbitrary",),
            vmem_limit_bytes=_vmem_limit_bytes()),
    )(xf, w_head_t, target, srw)
    accuracy, hf_loss, loss_reg = (o[0, 0] for o in outs)
    return accuracy, hf_loss, loss_reg


# ============================ model glue ============================

def init_params(key):
    ks = jax.random.split(key, 6)
    sc = 0.02
    bf = jnp.bfloat16
    return {
        'embed': sc * jax.random.normal(ks[0], (V, H), jnp.float32),
        'ln1': jnp.ones((1, H), jnp.float32),
        'ln2': jnp.ones((1, H), jnp.float32),
        'lnf': jnp.ones((1, H), jnp.float32),
        # fused q|k|v projection
        'wqkv': (sc * jax.random.normal(ks[1], (H, 3 * H), jnp.float32)).astype(bf),
        'wo': (sc * jax.random.normal(ks[2], (H, H), jnp.float32)).astype(bf),
        # fused gate|up projection
        'wgu': (sc * jax.random.normal(ks[3], (H, 2 * F), jnp.float32)).astype(bf),
        'wd': (sc * jax.random.normal(ks[4], (F, H), jnp.float32)).astype(bf),
        # lm_head stored TRANSPOSED (V, H): contiguous row tiles for the
        # vocab-streaming head/loss kernel (DMA-friendly at real H=5120)
        'lm_head': (sc * jax.random.normal(ks[5], (V, H), jnp.float32)).astype(bf),
    }


def multi_llama_forward(p, lang_x, vision_x, attention_mask, labels,
                        loss_reweight, key_words_query=None):
    # reference: forward body only runs when labels.shape == lang_x.shape
    if labels.shape != lang_x.shape:
        return None
    b, s_len = lang_x.shape

    # embedding_layer.flag = 'Text'; weight shared with lang_model input embeddings
    ids_flat = lang_x.astype(jnp.int32).reshape(b * s_len)
    x = pallas_embed(ids_flat, p['embed'])                # (B*S, H) f32
    # TODO(synk): MyEmbedding's vision encoder / key-word matching branch
    # (loss_match) has no source in the reference; vision_x and key_words_query
    # are accepted but unused, loss_match = None.
    loss_match = None

    # ---- RoPE tables (glue), folded for roll-based rotate_half ----
    pos = jnp.arange(s_len, dtype=jnp.float32)
    inv = 1.0 / (10000.0 ** (jnp.arange(0, DH, 2, dtype=jnp.float32) / DH))
    ang = pos[:, None] * inv[None, :]                                  # (S, DH/2)
    cos_d = jnp.concatenate([jnp.cos(ang), jnp.cos(ang)], axis=-1)     # (S, DH)
    sin_d = jnp.concatenate([jnp.sin(ang), jnp.sin(ang)], axis=-1)
    lane_lo = (jnp.arange(H) % DH) < HALF                              # first half of each head
    cosf = jnp.tile(cos_d, (1, NH))                                    # (S, H)
    sinf = jnp.tile(sin_d, (1, NH))
    sina = jnp.where(lane_lo[None, :], -sinf, 0.0)   # pairs with roll(t, -HALF) -> t[i+HALF]
    sinb = jnp.where(lane_lo[None, :], 0.0, sinf)    # pairs with roll(t, +HALF) -> t[i-HALF]
    cosf, sina, sinb = (jnp.tile(t, (b, 1)) for t in (cosf, sina, sinb))   # (B*S, H)

    mask_flat = attention_mask.astype(jnp.float32).reshape(1, b * s_len)

    # ---- fused decoder layer (+ final norm), whole batch in one block ----
    xf = pallas_decoder_layer(x, mask_flat, cosf, sina, sinb, p)       # (B*S, H) bf16

    # shifted labels / reweights, padded back to length S (last column ignored)
    labels_i = labels.astype(jnp.int32)
    target = jnp.concatenate(
        [labels_i[:, 1:], jnp.full((b, 1), -100, jnp.int32)],
        axis=-1).reshape(b * s_len, 1)
    srw = jnp.concatenate(
        [loss_reweight.astype(jnp.float32)[:, 1:],
         jnp.zeros((b, 1), jnp.float32)], axis=-1).reshape(b * s_len, 1)

    # ---- fused LM head + weighted CE + HF loss + accuracy ----
    accuracy, hf_loss, loss_reg = pallas_head_and_loss(
        xf, p['lm_head'], target, srw)

    loss = loss_reg
    if loss_match is not None:
        loss = 0.8 * loss + 0.2 * loss_match
    del loss  # reference computes this but returns output['loss'] instead

    return dict(logits=accuracy, loss=hf_loss)


# ============================ driver ============================

if __name__ == "__main__":
    key = jax.random.PRNGKey(0)
    kp, kx, kv, kr = jax.random.split(key, 4)

    params = init_params(kp)

    lang_x = jax.random.randint(kx, (B, S), 0, V, dtype=jnp.int32)
    # vision_x: (B, num_images, C, H, W, D) placeholder (unused, see TODO above)
    vision_x = jax.random.normal(kv, (B, 1, 3, 8, 8, 4), jnp.float32)
    attention_mask = jnp.ones((B, S), jnp.float32)
    labels = lang_x.at[:, 0].set(-100)                  # first token ignored
    loss_reweight = 0.5 + jax.random.uniform(kr, (B, S), jnp.float32)

    out = multi_llama_forward(params, lang_x, vision_x, attention_mask,
                              labels, loss_reweight, None)
    jax.block_until_ready((out['logits'], out['loss']))
    print("KERNEL_OK")
</pallas_src>

<mosaic_0001>
module attributes {stable_mosaic.version = 11 : i64} {
  func.func @_gather_kernel(%arg0: i32, %arg1: memref<16xi32, #tpu.memory_space<smem>>, %arg2: memref<512x128xf32, #tpu.memory_space<any>>, %arg3: memref<8x128xf32, #tpu.memory_space<vmem>>, %arg4: memref<8x!tpu.dma_semaphore, #tpu.memory_space<semaphore_mem>>) attributes {dimension_semantics = [#tpu.dimension_semantics<arbitrary>], iteration_bounds = array<i64: 2>, scalar_prefetch = 1 : i64, scratch_operands = 1 : i64, tpu.core_type = #tpu.core_type<tc>, window_params = [{}, {transform_indices = @transform_1, window_bounds = array<i64: 8, 128>}]} {
    %c8_i32 = arith.constant 8 : i32
    %0 = arith.muli %arg0, %c8_i32 : i32
    %c0_i32 = arith.constant 0 : i32
    %1 = arith.addi %0, %c0_i32 : i32
    %2 = arith.index_cast %1 : i32 to index
    %3 = memref.load %arg1[%2] : memref<16xi32, #tpu.memory_space<smem>>
    %c0_i32_0 = arith.constant 0 : i32
    %c0_i32_1 = arith.constant 0 : i32
    %c0_i32_2 = arith.constant 0 : i32
    %4 = tpu.memref_slice %arg2[%3, %c0_i32_2] : memref<512x128xf32, #tpu.memory_space<any>> -> memref<1x128xf32, #tpu.memory_space<any>>
    %5 = tpu.memref_squeeze %4 : memref<1x128xf32, #tpu.memory_space<any>> -> memref<128xf32, #tpu.memory_space<any>>
    %c0_i32_3 = arith.constant 0 : i32
    %6 = tpu.memref_slice %arg3[%c0_i32_0, %c0_i32_3] : memref<8x128xf32, #tpu.memory_space<vmem>> -> memref<1x128xf32, #tpu.memory_space<vmem>>
    %7 = tpu.memref_squeeze %6 : memref<1x128xf32, #tpu.memory_space<vmem>> -> memref<128xf32, #tpu.memory_space<vmem>>
    %8 = tpu.memref_slice %arg4[%c0_i32_1] : memref<8x!tpu.dma_semaphore, #tpu.memory_space<semaphore_mem>> -> memref<1x!tpu.dma_semaphore, #tpu.memory_space<semaphore_mem>>
    %9 = tpu.memref_squeeze %8 : memref<1x!tpu.dma_semaphore, #tpu.memory_space<semaphore_mem>> -> memref<!tpu.dma_semaphore, #tpu.memory_space<semaphore_mem>>
    tpu.enqueue_dma source(%5 : memref<128xf32, #tpu.memory_space<any>>) target(%7 : memref<128xf32, #tpu.memory_space<vmem>>) target_semaphore(%9 : memref<!tpu.dma_semaphore, #tpu.memory_space<semaphore_mem>>)
    %c1_i32 = arith.constant 1 : i32
    %10 = arith.addi %0, %c1_i32 : i32
    %11 = arith.index_cast %10 : i32 to index
    %12 = memref.load %arg1[%11] : memref<16xi32, #tpu.memory_space<smem>>
    %c1_i32_4 = arith.constant 1 : i32
    %c1_i32_5 = arith.constant 1 : i32
    %c0_i32_6 = arith.constant 0 : i32
    %13 = tpu.memref_slice %arg2[%12, %c0_i32_6] : memref<512x128xf32, #tpu.memory_space<any>> -> memref<1x128xf32, #tpu.memory_space<any>>
    %14 = tpu.memref_squeeze %13 : memref<1x128xf32, #tpu.memory_space<any>> -> memref<128xf32, #tpu.memory_space<any>>
    %c0_i32_7 = arith.constant 0 : i32
    %15 = tpu.memref_slice %arg3[%c1_i32_4, %c0_i32_7] : memref<8x128xf32, #tpu.memory_space<vmem>> -> memref<1x128xf32, #tpu.memory_space<vmem>>
    %16 = tpu.memref_squeeze %15 : memref<1x128xf32, #tpu.memory_space<vmem>> -> memref<128xf32, #tpu.memory_space<vmem>>
    %17 = tpu.memref_slice %arg4[%c1_i32_5] : memref<8x!tpu.dma_semaphore, #tpu.memory_space<semaphore_mem>> -> memref<1x!tpu.dma_semaphore, #tpu.memory_space<semaphore_mem>>
    %18 = tpu.memref_squeeze %17 : memref<1x!tpu.dma_semaphore, #tpu.memory_space<semaphore_mem>> -> memref<!tpu.dma_semaphore, #tpu.memory_space<semaphore_mem>>
    tpu.enqueue_dma source(%14 : memref<128xf32, #tpu.memory_space<any>>) target(%16 : memref<128xf32, #tpu.memory_space<vmem>>) target_semaphore(%18 : memref<!tpu.dma_semaphore, #tpu.memory_space<semaphore_mem>>)
    %c2_i32 = arith.constant 2 : i32
    %19 = arith.addi %0, %c2_i32 : i32
    %20 = arith.index_cast %19 : i32 to index
    %21 = memref.load %arg1[%20] : memref<16xi32, #tpu.memory_space<smem>>
    %c2_i32_8 = arith.constant 2 : i32
    %c2_i32_9 = arith.constant 2 : i32
    %c0_i32_10 = arith.constant 0 : i32
    %22 = tpu.memref_slice %arg2[%21, %c0_i32_10] : memref<512x128xf32, #tpu.memory_space<any>> -> memref<1x128xf32, #tpu.memory_space<any>>
    %23 = tpu.memref_squeeze %22 : memref<1x128xf32, #tpu.memory_space<any>> -> memref<128xf32, #tpu.memory_space<any>>
    %c0_i32_11 = arith.constant 0 : i32
    %24 = tpu.memref_slice %arg3[%c2_i32_8, %c0_i32_11] : memref<8x128xf32, #tpu.memory_space<vmem>> -> memref<1x128xf32, #tpu.memory_space<vmem>>
    %25 = tpu.memref_squeeze %24 : memref<1x128xf32, #tpu.memory_space<vmem>> -> memref<128xf32, #tpu.memory_space<vmem>>
    %26 = tpu.memref_slice %arg4[%c2_i32_9] : memref<8x!tpu.dma_semaphore, #tpu.memory_space<semaphore_mem>> -> memref<1x!tpu.dma_semaphore, #tpu.memory_space<semaphore_mem>>
    %27 = tpu.memref_squeeze %26 : memref<1x!tpu.dma_semaphore, #tpu.memory_space<semaphore_mem>> -> memref<!tpu.dma_semaphore, #tpu.memory_space<semaphore_mem>>
    tpu.enqueue_dma source(%23 : memref<128xf32, #tpu.memory_space<any>>) target(%25 : memref<128xf32, #tpu.memory_space<vmem>>) target_semaphore(%27 : memref<!tpu.dma_semaphore, #tpu.memory_space<semaphore_mem>>)
    %c3_i32 = arith.constant 3 : i32
    %28 = arith.addi %0, %c3_i32 : i32
    %29 = arith.index_cast %28 : i32 to index
    %30 = memref.load %arg1[%29] : memref<16xi32, #tpu.memory_space<smem>>
    %c3_i32_12 = arith.constant 3 : i32
    %c3_i32_13 = arith.constant 3 : i32
    %c0_i32_14 = arith.constant 0 : i32
    %31 = tpu.memref_slice %arg2[%30, %c0_i32_14] : memref<512x128xf32, #tpu.memory_space<any>> -> memref<1x128xf32, #tpu.memory_space<any>>
    %32 = tpu.memref_squeeze %31 : memref<1x128xf32, #tpu.memory_space<any>> -> memref<128xf32, #tpu.memory_space<any>>
    %c0_i32_15 = arith.constant 0 : i32
    %33 = tpu.memref_slice %arg3[%c3_i32_12, %c0_i32_15] : memref<8x128xf32, #tpu.memory_space<vmem>> -> memref<1x128xf32, #tpu.memory_space<vmem>>
    %34 = tpu.memref_squeeze %33 : memref<1x128xf32, #tpu.memory_space<vmem>> -> memref<128xf32, #tpu.memory_space<vmem>>
    %35 = tpu.memref_slice %arg4[%c3_i32_13] : memref<8x!tpu.dma_semaphore, #tpu.memory_space<semaphore_mem>> -> memref<1x!tpu.dma_semaphore, #tpu.memory_space<semaphore_mem>>
    %36 = tpu.memref_squeeze %35 : memref<1x!tpu.dma_semaphore, #tpu.memory_space<semaphore_mem>> -> memref<!tpu.dma_semaphore, #tpu.memory_space<semaphore_mem>>
    tpu.enqueue_dma source(%32 : memref<128xf32, #tpu.memory_space<any>>) target(%34 : memref<128xf32, #tpu.memory_space<vmem>>) target_semaphore(%36 : memref<!tpu.dma_semaphore, #tpu.memory_space<semaphore_mem>>)
    %c4_i32 = arith.constant 4 : i32
    %37 = arith.addi %0, %c4_i32 : i32
    %38 = arith.index_cast %37 : i32 to index
    %39 = memref.load %arg1[%38] : memref<16xi32, #tpu.memory_space<smem>>
    %c4_i32_16 = arith.constant 4 : i32
    %c4_i32_17 = arith.constant 4 : i32
    %c0_i32_18 = arith.constant 0 : i32
    %40 = tpu.memref_slice %arg2[%39, %c0_i32_18] : memref<512x128xf32, #tpu.memory_space<any>> -> memref<1x128xf32, #tpu.memory_space<any>>
    %41 = tpu.memref_squeeze %40 : memref<1x128xf32, #tpu.memory_space<any>> -> memref<128xf32, #tpu.memory_space<any>>
    %c0_i32_19 = arith.constant 0 : i32
    %42 = tpu.memref_slice %arg3[%c4_i32_16, %c0_i32_19] : memref<8x128xf32, #tpu.memory_space<vmem>> -> memref<1x128xf32, #tpu.memory_space<vmem>>
    %43 = tpu.memref_squeeze %42 : memref<1x128xf32, #tpu.memory_space<vmem>> -> memref<128xf32, #tpu.memory_space<vmem>>
    %44 = tpu.memref_slice %arg4[%c4_i32_17] : memref<8x!tpu.dma_semaphore, #tpu.memory_space<semaphore_mem>> -> memref<1x!tpu.dma_semaphore, #tpu.memory_space<semaphore_mem>>
    %45 = tpu.memref_squeeze %44 : memref<1x!tpu.dma_semaphore, #tpu.memory_space<semaphore_mem>> -> memref<!tpu.dma_semaphore, #tpu.memory_space<semaphore_mem>>
    tpu.enqueue_dma source(%41 : memref<128xf32, #tpu.memory_space<any>>) target(%43 : memref<128xf32, #tpu.memory_space<vmem>>) target_semaphore(%45 : memref<!tpu.dma_semaphore, #tpu.memory_space<semaphore_mem>>)
    %c5_i32 = arith.constant 5 : i32
    %46 = arith.addi %0, %c5_i32 : i32
    %47 = arith.index_cast %46 : i32 to index
    %48 = memref.load %arg1[%47] : memref<16xi32, #tpu.memory_space<smem>>
    %c5_i32_20 = arith.constant 5 : i32
    %c5_i32_21 = arith.constant 5 : i32
    %c0_i32_22 = arith.constant 0 : i32
    %49 = tpu.memref_slice %arg2[%48, %c0_i32_22] : memref<512x128xf32, #tpu.memory_space<any>> -> memref<1x128xf32, #tpu.memory_space<any>>
    %50 = tpu.memref_squeeze %49 : memref<1x128xf32, #tpu.memory_space<any>> -> memref<128xf32, #tpu.memory_space<any>>
    %c0_i32_23 = arith.constant 0 : i32
    %51 = tpu.memref_slice %arg3[%c5_i32_20, %c0_i32_23] : memref<8x128xf32, #tpu.memory_space<vmem>> -> memref<1x128xf32, #tpu.memory_space<vmem>>
    %52 = tpu.memref_squeeze %51 : memref<1x128xf32, #tpu.memory_space<vmem>> -> memref<128xf32, #tpu.memory_space<vmem>>
    %53 = tpu.memref_slice %arg4[%c5_i32_21] : memref<8x!tpu.dma_semaphore, #tpu.memory_space<semaphore_mem>> -> memref<1x!tpu.dma_semaphore, #tpu.memory_space<semaphore_mem>>
    %54 = tpu.memref_squeeze %53 : memref<1x!tpu.dma_semaphore, #tpu.memory_space<semaphore_mem>> -> memref<!tpu.dma_semaphore, #tpu.memory_space<semaphore_mem>>
    tpu.enqueue_dma source(%50 : memref<128xf32, #tpu.memory_space<any>>) target(%52 : memref<128xf32, #tpu.memory_space<vmem>>) target_semaphore(%54 : memref<!tpu.dma_semaphore, #tpu.memory_space<semaphore_mem>>)
    %c6_i32 = arith.constant 6 : i32
    %55 = arith.addi %0, %c6_i32 : i32
    %56 = arith.index_cast %55 : i32 to index
    %57 = memref.load %arg1[%56] : memref<16xi32, #tpu.memory_space<smem>>
    %c6_i32_24 = arith.constant 6 : i32
    %c6_i32_25 = arith.constant 6 : i32
    %c0_i32_26 = arith.constant 0 : i32
    %58 = tpu.memref_slice %arg2[%57, %c0_i32_26] : memref<512x128xf32, #tpu.memory_space<any>> -> memref<1x128xf32, #tpu.memory_space<any>>
    %59 = tpu.memref_squeeze %58 : memref<1x128xf32, #tpu.memory_space<any>> -> memref<128xf32, #tpu.memory_space<any>>
    %c0_i32_27 = arith.constant 0 : i32
    %60 = tpu.memref_slice %arg3[%c6_i32_24, %c0_i32_27] : memref<8x128xf32, #tpu.memory_space<vmem>> -> memref<1x128xf32, #tpu.memory_space<vmem>>
    %61 = tpu.memref_squeeze %60 : memref<1x128xf32, #tpu.memory_space<vmem>> -> memref<128xf32, #tpu.memory_space<vmem>>
    %62 = tpu.memref_slice %arg4[%c6_i32_25] : memref<8x!tpu.dma_semaphore, #tpu.memory_space<semaphore_mem>> -> memref<1x!tpu.dma_semaphore, #tpu.memory_space<semaphore_mem>>
    %63 = tpu.memref_squeeze %62 : memref<1x!tpu.dma_semaphore, #tpu.memory_space<semaphore_mem>> -> memref<!tpu.dma_semaphore, #tpu.memory_space<semaphore_mem>>
    tpu.enqueue_dma source(%59 : memref<128xf32, #tpu.memory_space<any>>) target(%61 : memref<128xf32, #tpu.memory_space<vmem>>) target_semaphore(%63 : memref<!tpu.dma_semaphore, #tpu.memory_space<semaphore_mem>>)
    %c7_i32 = arith.constant 7 : i32
    %64 = arith.addi %0, %c7_i32 : i32
    %65 = arith.index_cast %64 : i32 to index
    %66 = memref.load %arg1[%65] : memref<16xi32, #tpu.memory_space<smem>>
    %c7_i32_28 = arith.constant 7 : i32
    %c7_i32_29 = arith.constant 7 : i32
    %c0_i32_30 = arith.constant 0 : i32
    %67 = tpu.memref_slice %arg2[%66, %c0_i32_30] : memref<512x128xf32, #tpu.memory_space<any>> -> memref<1x128xf32, #tpu.memory_space<any>>
    %68 = tpu.memref_squeeze %67 : memref<1x128xf32, #tpu.memory_space<any>> -> memref<128xf32, #tpu.memory_space<any>>
    %c0_i32_31 = arith.constant 0 : i32
    %69 = tpu.memref_slice %arg3[%c7_i32_28, %c0_i32_31] : memref<8x128xf32, #tpu.memory_space<vmem>> -> memref<1x128xf32, #tpu.memory_space<vmem>>
    %70 = tpu.memref_squeeze %69 : memref<1x128xf32, #tpu.memory_space<vmem>> -> memref<128xf32, #tpu.memory_space<vmem>>
    %71 = tpu.memref_slice %arg4[%c7_i32_29] : memref<8x!tpu.dma_semaphore, #tpu.memory_space<semaphore_mem>> -> memref<1x!tpu.dma_semaphore, #tpu.memory_space<semaphore_mem>>
    %72 = tpu.memref_squeeze %71 : memref<1x!tpu.dma_semaphore, #tpu.memory_space<semaphore_mem>> -> memref<!tpu.dma_semaphore, #tpu.memory_space<semaphore_mem>>
    tpu.enqueue_dma source(%68 : memref<128xf32, #tpu.memory_space<any>>) target(%70 : memref<128xf32, #tpu.memory_space<vmem>>) target_semaphore(%72 : memref<!tpu.dma_semaphore, #tpu.memory_space<semaphore_mem>>)
    %c0_i32_32 = arith.constant 0 : i32
    %73 = arith.addi %0, %c0_i32_32 : i32
    %74 = arith.index_cast %73 : i32 to index
    %75 = memref.load %arg1[%74] : memref<16xi32, #tpu.memory_space<smem>>
    %c0_i32_33 = arith.constant 0 : i32
    %c0_i32_34 = arith.constant 0 : i32
    %c0_i32_35 = arith.constant 0 : i32
    %76 = tpu.memref_slice %arg2[%75, %c0_i32_35] : memref<512x128xf32, #tpu.memory_space<any>> -> memref<1x128xf32, #tpu.memory_space<any>>
    %77 = tpu.memref_squeeze %76 : memref<1x128xf32, #tpu.memory_space<any>> -> memref<128xf32, #tpu.memory_space<any>>
    %c0_i32_36 = arith.constant 0 : i32
    %78 = tpu.memref_slice %arg3[%c0_i32_33, %c0_i32_36] : memref<8x128xf32, #tpu.memory_space<vmem>> -> memref<1x128xf32, #tpu.memory_space<vmem>>
    %79 = tpu.memref_squeeze %78 : memref<1x128xf32, #tpu.memory_space<vmem>> -> memref<128xf32, #tpu.memory_space<vmem>>
    %80 = tpu.memref_slice %arg4[%c0_i32_34] : memref<8x!tpu.dma_semaphore, #tpu.memory_space<semaphore_mem>> -> memref<1x!tpu.dma_semaphore, #tpu.memory_space<semaphore_mem>>
    %81 = tpu.memref_squeeze %80 : memref<1x!tpu.dma_semaphore, #tpu.memory_space<semaphore_mem>> -> memref<!tpu.dma_semaphore, #tpu.memory_space<semaphore_mem>>
    tpu.wait_dma2 semaphore(%81 : memref<!tpu.dma_semaphore, #tpu.memory_space<semaphore_mem>>) src(%77 : memref<128xf32, #tpu.memory_space<any>>) dst(%79 : memref<128xf32, #tpu.memory_space<vmem>>)
    %c1_i32_37 = arith.constant 1 : i32
    %82 = arith.addi %0, %c1_i32_37 : i32
    %83 = arith.index_cast %82 : i32 to index
    %84 = memref.load %arg1[%83] : memref<16xi32, #tpu.memory_space<smem>>
    %c1_i32_38 = arith.constant 1 : i32
    %c1_i32_39 = arith.constant 1 : i32
    %c0_i32_40 = arith.constant 0 : i32
    %85 = tpu.memref_slice %arg2[%84, %c0_i32_40] : memref<512x128xf32, #tpu.memory_space<any>> -> memref<1x128xf32, #tpu.memory_space<any>>
    %86 = tpu.memref_squeeze %85 : memref<1x128xf32, #tpu.memory_space<any>> -> memref<128xf32, #tpu.memory_space<any>>
    %c0_i32_41 = arith.constant 0 : i32
    %87 = tpu.memref_slice %arg3[%c1_i32_38, %c0_i32_41] : memref<8x128xf32, #tpu.memory_space<vmem>> -> memref<1x128xf32, #tpu.memory_space<vmem>>
    %88 = tpu.memref_squeeze %87 : memref<1x128xf32, #tpu.memory_space<vmem>> -> memref<128xf32, #tpu.memory_space<vmem>>
    %89 = tpu.memref_slice %arg4[%c1_i32_39] : memref<8x!tpu.dma_semaphore, #tpu.memory_space<semaphore_mem>> -> memref<1x!tpu.dma_semaphore, #tpu.memory_space<semaphore_mem>>
    %90 = tpu.memref_squeeze %89 : memref<1x!tpu.dma_semaphore, #tpu.memory_space<semaphore_mem>> -> memref<!tpu.dma_semaphore, #tpu.memory_space<semaphore_mem>>
    tpu.wait_dma2 semaphore(%90 : memref<!tpu.dma_semaphore, #tpu.memory_space<semaphore_mem>>) src(%86 : memref<128xf32, #tpu.memory_space<any>>) dst(%88 : memref<128xf32, #tpu.memory_space<vmem>>)
    %c2_i32_42 = arith.constant 2 : i32
    %91 = arith.addi %0, %c2_i32_42 : i32
    %92 = arith.index_cast %91 : i32 to index
    %93 = memref.load %arg1[%92] : memref<16xi32, #tpu.memory_space<smem>>
    %c2_i32_43 = arith.constant 2 : i32
    %c2_i32_44 = arith.constant 2 : i32
    %c0_i32_45 = arith.constant 0 : i32
    %94 = tpu.memref_slice %arg2[%93, %c0_i32_45] : memref<512x128xf32, #tpu.memory_space<any>> -> memref<1x128xf32, #tpu.memory_space<any>>
    %95 = tpu.memref_squeeze %94 : memref<1x128xf32, #tpu.memory_space<any>> -> memref<128xf32, #tpu.memory_space<any>>
    %c0_i32_46 = arith.constant 0 : i32
    %96 = tpu.memref_slice %arg3[%c2_i32_43, %c0_i32_46] : memref<8x128xf32, #tpu.memory_space<vmem>> -> memref<1x128xf32, #tpu.memory_space<vmem>>
    %97 = tpu.memref_squeeze %96 : memref<1x128xf32, #tpu.memory_space<vmem>> -> memref<128xf32, #tpu.memory_space<vmem>>
    %98 = tpu.memref_slice %arg4[%c2_i32_44] : memref<8x!tpu.dma_semaphore, #tpu.memory_space<semaphore_mem>> -> memref<1x!tpu.dma_semaphore, #tpu.memory_space<semaphore_mem>>
    %99 = tpu.memref_squeeze %98 : memref<1x!tpu.dma_semaphore, #tpu.memory_space<semaphore_mem>> -> memref<!tpu.dma_semaphore, #tpu.memory_space<semaphore_mem>>
    tpu.wait_dma2 semaphore(%99 : memref<!tpu.dma_semaphore, #tpu.memory_space<semaphore_mem>>) src(%95 : memref<128xf32, #tpu.memory_space<any>>) dst(%97 : memref<128xf32, #tpu.memory_space<vmem>>)
    %c3_i32_47 = arith.constant 3 : i32
    %100 = arith.addi %0, %c3_i32_47 : i32
    %101 = arith.index_cast %100 : i32 to index
    %102 = memref.load %arg1[%101] : memref<16xi32, #tpu.memory_space<smem>>
    %c3_i32_48 = arith.constant 3 : i32
    %c3_i32_49 = arith.constant 3 : i32
    %c0_i32_50 = arith.constant 0 : i32
    %103 = tpu.memref_slice %arg2[%102, %c0_i32_50] : memref<512x128xf32, #tpu.memory_space<any>> -> memref<1x128xf32, #tpu.memory_space<any>>
    %104 = tpu.memref_squeeze %103 : memref<1x128xf32, #tpu.memory_space<any>> -> memref<128xf32, #tpu.memory_space<any>>
    %c0_i32_51 = arith.constant 0 : i32
    %105 = tpu.memref_slice %arg3[%c3_i32_48, %c0_i32_51] : memref<8x128xf32, #tpu.memory_space<vmem>> -> memref<1x128xf32, #tpu.memory_space<vmem>>
    %106 = tpu.memref_squeeze %105 : memref<1x128xf32, #tpu.memory_space<vmem>> -> memref<128xf32, #tpu.memory_space<vmem>>
    %107 = tpu.memref_slice %arg4[%c3_i32_49] : memref<8x!tpu.dma_semaphore, #tpu.memory_space<semaphore_mem>> -> memref<1x!tpu.dma_semaphore, #tpu.memory_space<semaphore_mem>>
    %108 = tpu.memref_squeeze %107 : memref<1x!tpu.dma_semaphore, #tpu.memory_space<semaphore_mem>> -> memref<!tpu.dma_semaphore, #tpu.memory_space<semaphore_mem>>
    tpu.wait_dma2 semaphore(%108 : memref<!tpu.dma_semaphore, #tpu.memory_space<semaphore_mem>>) src(%104 : memref<128xf32, #tpu.memory_space<any>>) dst(%106 : memref<128xf32, #tpu.memory_space<vmem>>)
    %c4_i32_52 = arith.constant 4 : i32
    %109 = arith.addi %0, %c4_i32_52 : i32
    %110 = arith.index_cast %109 : i32 to index
    %111 = memref.load %arg1[%110] : memref<16xi32, #tpu.memory_space<smem>>
    %c4_i32_53 = arith.constant 4 : i32
    %c4_i32_54 = arith.constant 4 : i32
    %c0_i32_55 = arith.constant 0 : i32
    %112 = tpu.memref_slice %arg2[%111, %c0_i32_55] : memref<512x128xf32, #tpu.memory_space<any>> -> memref<1x128xf32, #tpu.memory_space<any>>
    %113 = tpu.memref_squeeze %112 : memref<1x128xf32, #tpu.memory_space<any>> -> memref<128xf32, #tpu.memory_space<any>>
    %c0_i32_56 = arith.constant 0 : i32
    %114 = tpu.memref_slice %arg3[%c4_i32_53, %c0_i32_56] : memref<8x128xf32, #tpu.memory_space<vmem>> -> memref<1x128xf32, #tpu.memory_space<vmem>>
    %115 = tpu.memref_squeeze %114 : memref<1x128xf32, #tpu.memory_space<vmem>> -> memref<128xf32, #tpu.memory_space<vmem>>
    %116 = tpu.memref_slice %arg4[%c4_i32_54] : memref<8x!tpu.dma_semaphore, #tpu.memory_space<semaphore_mem>> -> memref<1x!tpu.dma_semaphore, #tpu.memory_space<semaphore_mem>>
    %117 = tpu.memref_squeeze %116 : memref<1x!tpu.dma_semaphore, #tpu.memory_space<semaphore_mem>> -> memref<!tpu.dma_semaphore, #tpu.memory_space<semaphore_mem>>
    tpu.wait_dma2 semaphore(%117 : memref<!tpu.dma_semaphore, #tpu.memory_space<semaphore_mem>>) src(%113 : memref<128xf32, #tpu.memory_space<any>>) dst(%115 : memref<128xf32, #tpu.memory_space<vmem>>)
    %c5_i32_57 = arith.constant 5 : i32
    %118 = arith.addi %0, %c5_i32_57 : i32
    %119 = arith.index_cast %118 : i32 to index
    %120 = memref.load %arg1[%119] : memref<16xi32, #tpu.memory_space<smem>>
    %c5_i32_58 = arith.constant 5 : i32
    %c5_i32_59 = arith.constant 5 : i32
    %c0_i32_60 = arith.constant 0 : i32
    %121 = tpu.memref_slice %arg2[%120, %c0_i32_60] : memref<512x128xf32, #tpu.memory_space<any>> -> memref<1x128xf32, #tpu.memory_space<any>>
    %122 = tpu.memref_squeeze %121 : memref<1x128xf32, #tpu.memory_space<any>> -> memref<128xf32, #tpu.memory_space<any>>
    %c0_i32_61 = arith.constant 0 : i32
    %123 = tpu.memref_slice %arg3[%c5_i32_58, %c0_i32_61] : memref<8x128xf32, #tpu.memory_space<vmem>> -> memref<1x128xf32, #tpu.memory_space<vmem>>
    %124 = tpu.memref_squeeze %123 : memref<1x128xf32, #tpu.memory_space<vmem>> -> memref<128xf32, #tpu.memory_space<vmem>>
    %125 = tpu.memref_slice %arg4[%c5_i32_59] : memref<8x!tpu.dma_semaphore, #tpu.memory_space<semaphore_mem>> -> memref<1x!tpu.dma_semaphore, #tpu.memory_space<semaphore_mem>>
    %126 = tpu.memref_squeeze %125 : memref<1x!tpu.dma_semaphore, #tpu.memory_space<semaphore_mem>> -> memref<!tpu.dma_semaphore, #tpu.memory_space<semaphore_mem>>
    tpu.wait_dma2 semaphore(%126 : memref<!tpu.dma_semaphore, #tpu.memory_space<semaphore_mem>>) src(%122 : memref<128xf32, #tpu.memory_space<any>>) dst(%124 : memref<128xf32, #tpu.memory_space<vmem>>)
    %c6_i32_62 = arith.constant 6 : i32
    %127 = arith.addi %0, %c6_i32_62 : i32
    %128 = arith.index_cast %127 : i32 to index
    %129 = memref.load %arg1[%128] : memref<16xi32, #tpu.memory_space<smem>>
    %c6_i32_63 = arith.constant 6 : i32
    %c6_i32_64 = arith.constant 6 : i32
    %c0_i32_65 = arith.constant 0 : i32
    %130 = tpu.memref_slice %arg2[%129, %c0_i32_65] : memref<512x128xf32, #tpu.memory_space<any>> -> memref<1x128xf32, #tpu.memory_space<any>>
    %131 = tpu.memref_squeeze %130 : memref<1x128xf32, #tpu.memory_space<any>> -> memref<128xf32, #tpu.memory_space<any>>
    %c0_i32_66 = arith.constant 0 : i32
    %132 = tpu.memref_slice %arg3[%c6_i32_63, %c0_i32_66] : memref<8x128xf32, #tpu.memory_space<vmem>> -> memref<1x128xf32, #tpu.memory_space<vmem>>
    %133 = tpu.memref_squeeze %132 : memref<1x128xf32, #tpu.memory_space<vmem>> -> memref<128xf32, #tpu.memory_space<vmem>>
    %134 = tpu.memref_slice %arg4[%c6_i32_64] : memref<8x!tpu.dma_semaphore, #tpu.memory_space<semaphore_mem>> -> memref<1x!tpu.dma_semaphore, #tpu.memory_space<semaphore_mem>>
    %135 = tpu.memref_squeeze %134 : memref<1x!tpu.dma_semaphore, #tpu.memory_space<semaphore_mem>> -> memref<!tpu.dma_semaphore, #tpu.memory_space<semaphore_mem>>
    tpu.wait_dma2 semaphore(%135 : memref<!tpu.dma_semaphore, #tpu.memory_space<semaphore_mem>>) src(%131 : memref<128xf32, #tpu.memory_space<any>>) dst(%133 : memref<128xf32, #tpu.memory_space<vmem>>)
    %c7_i32_67 = arith.constant 7 : i32
    %136 = arith.addi %0, %c7_i32_67 : i32
    %137 = arith.index_cast %136 : i32 to index
    %138 = memref.load %arg1[%137] : memref<16xi32, #tpu.memory_space<smem>>
    %c7_i32_68 = arith.constant 7 : i32
    %c7_i32_69 = arith.constant 7 : i32
    %c0_i32_70 = arith.constant 0 : i32
    %139 = tpu.memref_slice %arg2[%138, %c0_i32_70] : memref<512x128xf32, #tpu.memory_space<any>> -> memref<1x128xf32, #tpu.memory_space<any>>
    %140 = tpu.memref_squeeze %139 : memref<1x128xf32, #tpu.memory_space<any>> -> memref<128xf32, #tpu.memory_space<any>>
    %c0_i32_71 = arith.constant 0 : i32
    %141 = tpu.memref_slice %arg3[%c7_i32_68, %c0_i32_71] : memref<8x128xf32, #tpu.memory_space<vmem>> -> memref<1x128xf32, #tpu.memory_space<vmem>>
    %142 = tpu.memref_squeeze %141 : memref<1x128xf32, #tpu.memory_space<vmem>> -> memref<128xf32, #tpu.memory_space<vmem>>
    %143 = tpu.memref_slice %arg4[%c7_i32_69] : memref<8x!tpu.dma_semaphore, #tpu.memory_space<semaphore_mem>> -> memref<1x!tpu.dma_semaphore, #tpu.memory_space<semaphore_mem>>
    %144 = tpu.memref_squeeze %143 : memref<1x!tpu.dma_semaphore, #tpu.memory_space<semaphore_mem>> -> memref<!tpu.dma_semaphore, #tpu.memory_space<semaphore_mem>>
    tpu.wait_dma2 semaphore(%144 : memref<!tpu.dma_semaphore, #tpu.memory_space<semaphore_mem>>) src(%140 : memref<128xf32, #tpu.memory_space<any>>) dst(%142 : memref<128xf32, #tpu.memory_space<vmem>>)
    return
  }
  func.func @transform_1(%arg0: i32, %arg1: memref<16xi32, #tpu.memory_space<smem>>) -> (i32, i32) {
    %c0_i32 = arith.constant 0 : i32
    %c0_i32_0 = arith.constant 0 : i32
    return %arg0, %c0_i32 : i32, i32
  }
}

</mosaic_0001>

<bundles_post_ra>
// kernel: tpu_custom_call.1
= control target key start
LH: loop header
LB: loop body
LE: loop exit
PB: predicated region body
PF: predicated region fallthrough
CT: control target
= control target key end

     0   :  { %s758_s12 = smov [#allocation4]   ;;  %s1073_s0 = inlined_call_operand.hbm [shape: s32[16], index: 0, kind: input, shape index: {}]   ;;  %s1074_s1 = inlined_call_operand.hbm [shape: f32[512,128], index: 1, kind: input, shape index: {}]   ;;  %s1075_s2 = inlined_call_operand.hbm [shape: f32[16,128], index: 2, kind: output, shape index: {}]  }
   0x1   :  { %s8_s11 = sshll.u32 %s1073_s0, 4  ;;  %s9_s11 = int_to_ptr.hbm [resolvable:$true] %s8_s11 }
   0x2   :  { %11 = dma.hbm_to_smem %s9_s11, 16, %s758_s12, [#allocation3] }
   0x3   :  { %708 = dma.done.wait [#allocation3], 16 }
   0x4   :  { %709 = vsyncadd [#allocation3], 4294967280 }
   0x5   :  { %14 = sfence }
   0x6   :  { %15 = vsyncpa [#allocation6], 0 }
   0x7   :  { %17 = vsyncpa [#allocation6 + $0x1], 0  ;;  %s777_s13 = smov 0   ;;  %s779_s14 = smov 0  }
   0x8   :  { %s781_s15 = smov 0  }
   0x9 LB: > { %s344_s0 = sadd.s32 4294967295, %s756_s15   ;;  %s794_s16 = sadd.s32 1, %s756_s15   ;;  %s756_s15 = sphi %s781_s15, %s1083_s15   ;;  %s752_s14 = sphi %s779_s14, %s1082_s14   ;;  %s748_s13 = sphi %s777_s13, %s1081_s13  }
   0xa   : > { %s26_s17 = ssub.s32 %s756_s15, %s794_s16  ;;  %s29_s18 = sadd.s32 1, %s752_s14 }
   0xb   : > { %p27_p0 = scmp.eq.s32.totalorder %s26_s17, 0  ;;  %p345_p1 = scmp.ne.s32.totalorder %s26_s17, 0 }
   0xc   : > { %p33_p2 = scmp.eq.s32.totalorder %s756_s15, 1  ;;  %p38_p3 = scmp.ne.s32.totalorder %s752_s14, %s748_s13 }
   0xd   : > { %s803_s19 = scalar_select %p27_p0, %s752_s14, %s29_s18  }
   0xe   : > { %p805_p4 = por %p345_p1, %p33_p2  ;;  %p39_p5 = scmp.eq.s32.totalorder %s344_s0, 1 }
   0xf   : > { %p403_p6 = scmp.lt.s32.totalorder %s756_s15, 2  ;;  %s1076_s22 = sand.u32 1, %s752_s14  }
  0x10   : > { %p810_p7 = por %p39_p5, %p38_p3  ;;  %s347_s23 = sshll.u32 %s1076_s22, 3 }
  0x11   : > { %s818_s24 = sshll.u32 %s756_s15, 3  ;;  %s826_s29 = scalar_lea.vmem [#allocation5], %s347_s23 }
  0x12   : > { %s364_s25 = scalar_select %p403_p6, [#allocation4], [#allocation25] }
  0x13   : > { %s365_s26 = scalar_select %p403_p6, %s818_s24, 0 }
  0x14   : > { %s72_s27 = sadd.s32 1, %s818_s24  ;;  %s68_s30 = sshll.u32 %s826_s29, 4  ;;  %s834_s30 = int_to_ptr.vmem [resolvable:$true] %s68_s30 }
  0x15   : > { %s57_s28 = sld [smem:[%s364_s25 + %s365_s26]]  ;;  %s1085_s27 = smov (!%p403_p6, %s72_s27), 0 }
  0x16   : > { %s367_s3 = scalar_select %p403_p6, [#allocation4], [#allocation26] }
  0x17   : > { %s75_s4 = scalar_lea.vmem %s826_s29, 1 [#allocation5]  ;;  %s90_s12 = sadd.s32 2, %s818_s24 }
  0x18   : > { %s73_s5 = sld [smem:[%s367_s3 + %s1085_s27]]  ;;  %s843_s10 = sshll.u32 %s75_s4, 4  ;;  %s87_s10 = int_to_ptr.vmem [resolvable:$true] %s843_s10 }
  0x19   : > { %s838_s6 = scalar_select %p403_p6, [#allocation4], [#allocation27] }
  0x1a   : > { %s93_s0 = scalar_lea.vmem %s826_s29, 2 [#allocation5]  ;;  %s852_s26 = scalar_lea.hbm %s1074_s1, 512 }
  0x1b   : > { %s58_s9 = scalar_lea.hbm %s1074_s1, %s57_s28 }
  0x1c   : > { %s66_s11 = sshll.u32 %s58_s9, 4  ;;  %s67_s11 = int_to_ptr.hbm [resolvable:$true] %s66_s11 }
  0x1d   : > { %s442_s17 = sshra.s32 %s67_s11, 4  ;;  %s443_s17 = int_to_ptr.hbm [resolvable:$true] %s442_s17 }
  0x1e   : > { %s444_s18 = scalar_lea.hbm %s443_s17, 1  ;;  %p449_p11 = scmp.lt.s32.totalorder %s443_s17, %s1074_s1 }
  0x1f   : > { %p445_p8 = scmp.ne.s32.totalorder %s443_s17, %s444_s18  ;;  %p450_p12 = scmp.lt.s32.totalorder %s852_s26, %s444_s18 }
  0x21   : > { %p446_p9 = pnand %p445_p8, %p403_p6  ;;  %p451_p13 = por %p450_p12, %p449_p11 }
  0x23   : > { %p447_p10 = pneg %p446_p9 }
  0x25   : > { %p452_p0 = pnand %p451_p13, %p447_p10 }
  0x27   : > { %455 = shalt.err (!%p452_p0)  }
  0x28   : > { %366 = dma.hbm_to_vmem [thread:$0]  (%p403_p6), %s67_s11, 16, %s834_s30, [#allocation2] }
  0x29   : > { %s74_s7 = scalar_lea.hbm %s1074_s1, %s73_s5  ;;  %s865_s9 = sshll.u32 %s93_s0, 4  ;;  %s105_s9 = int_to_ptr.vmem [resolvable:$true] %s865_s9 }
  0x2a   : > { %s84_s8 = sshll.u32 %s74_s7, 4  ;;  %s108_s17 = sadd.s32 3, %s818_s24  ;;  %s85_s8 = int_to_ptr.hbm [resolvable:$true] %s84_s8 }
  0x2b   : > { %s470_s18 = sshra.s32 %s85_s8, 4  ;;  %s471_s18 = int_to_ptr.hbm [resolvable:$true] %s470_s18 }
  0x2c   : > { %s472_s23 = scalar_lea.hbm %s471_s18, 1  ;;  %p477_p5 = scmp.lt.s32.totalorder %s471_s18, %s1074_s1 }
  0x2d   : > { %p473_p1 = scmp.ne.s32.totalorder %s471_s18, %s472_s23  ;;  %p478_p8 = scmp.lt.s32.totalorder %s852_s26, %s472_s23 }
  0x2f   : > { %p474_p2 = pnand %p473_p1, %p403_p6  ;;  %p479_p9 = por %p478_p8, %p477_p5 }
  0x31   : > { %p475_p3 = pneg %p474_p2 }
  0x33   : > { %p480_p10 = pnand %p479_p9, %p475_p3 }
  0x35   : > { %483 = shalt.err (!%p480_p10)  }
  0x36   : > { %369 = dma.hbm_to_vmem [thread:$0]  (%p403_p6), %s85_s8, 16, %s87_s10, [#allocation2 + $0x1] }
  0x37   : > { %s1087_s12 = smov (!%p403_p6, %s90_s12), 0  ;;  %s1089_s17 = smov (!%p403_p6, %s108_s17), 0 }
  0x38   : > { %s373_s5 = scalar_select %p403_p6, [#allocation4], [#allocation28] }
  0x39   : > { %s91_s11 = sld [smem:[%s838_s6 + %s1087_s12]]  ;;  %s111_s0 = scalar_lea.vmem %s826_s29, 3 [#allocation5] }
  0x3a   : > { %s126_s28 = sadd.s32 4, %s818_s24  ;;  %s109_s3 = sld [smem:[%s373_s5 + %s1089_s17]] }
  0x3b   : > { %s129_s4 = scalar_lea.vmem %s826_s29, 4 [#allocation5]  ;;  %s1091_s28 = smov (!%p403_p6, %s126_s28), 0 }
  0x3c   : > { %s376_s7 = scalar_select %p403_p6, [#allocation4], [#allocation29] }
  0x3d   : > { %s896_s23 = sshll.u32 %s111_s0, 4  ;;  %s900_s25 = sshll.u32 %s129_s4, 4  ;;  %s123_s23 = int_to_ptr.vmem [resolvable:$true] %s896_s23  ;;  %s141_s25 = int_to_ptr.vmem [resolvable:$true] %s900_s25 }
  0x3e   : > { %s898_s12 = sld [smem:[%s376_s7 + %s1091_s28]] }
  0x3f   : > { %s92_s18 = scalar_lea.hbm %s1074_s1, %s91_s11 }
  0x40   : > { %s102_s6 = sshll.u32 %s92_s18, 4  ;;  %s103_s6 = int_to_ptr.hbm [resolvable:$true] %s102_s6 }
  0x41   : > { %s498_s27 = sshra.s32 %s103_s6, 4  ;;  %s499_s27 = int_to_ptr.hbm [resolvable:$true] %s498_s27 }
  0x42   : > { %s500_s17 = scalar_lea.hbm %s499_s27, 1  ;;  %p505_p0 = scmp.lt.s32.totalorder %s499_s27, %s1074_s1 }
  0x43   : > { %p501_p11 = scmp.ne.s32.totalorder %s499_s27, %s500_s17  ;;  %p506_p1 = scmp.lt.s32.totalorder %s852_s26, %s500_s17 }
  0x45   : > { %p502_p12 = pnand %p501_p11, %p403_p6  ;;  %p507_p2 = por %p506_p1, %p505_p0 }
  0x47   : > { %p503_p13 = pneg %p502_p12 }
  0x49   : > { %p508_p3 = pnand %p507_p2, %p503_p13 }
  0x4b   : > { %511 = shalt.err (!%p508_p3)  }
  0x4c   : > { %372 = dma.hbm_to_vmem [thread:$0]  (%p403_p6), %s103_s6, 16, %s105_s9, [#allocation2 + $0x2] }
  0x4d   : > { %s110_s28 = scalar_lea.hbm %s1074_s1, %s109_s3  ;;  %s147_s22 = scalar_lea.vmem %s826_s29, 5 [#allocation5] }
  0x4e   : > { %s120_s4 = sshll.u32 %s110_s28, 4  ;;  %s121_s4 = int_to_ptr.hbm [resolvable:$true] %s120_s4 }
  0x4f   : > { %s526_s7 = sshra.s32 %s121_s4, 4  ;;  %s527_s7 = int_to_ptr.hbm [resolvable:$true] %s526_s7 }
  0x50   : > { %s528_s10 = scalar_lea.hbm %s527_s7, 1  ;;  %p533_p10 = scmp.lt.s32.totalorder %s527_s7, %s1074_s1 }
  0x51   : > { %p529_p5 = scmp.ne.s32.totalorder %s527_s7, %s528_s10  ;;  %p534_p11 = scmp.lt.s32.totalorder %s852_s26, %s528_s10 }
  0x53   : > { %p530_p8 = pnand %p529_p5, %p403_p6  ;;  %p535_p12 = por %p534_p11, %p533_p10 }
  0x55   : > { %p531_p9 = pneg %p530_p8 }
  0x57   : > { %p536_p13 = pnand %p535_p12, %p531_p9 }
  0x59   : > { %539 = shalt.err (!%p536_p13)  }
  0x5a   : > { %375 = dma.hbm_to_vmem [thread:$0]  (%p403_p6), %s121_s4, 16, %s123_s23, [#allocation2 + $0x3] }
  0x5b   : > { %s128_s6 = scalar_lea.hbm %s1074_s1, %s898_s12  ;;  %s144_s27 = sadd.s32 5, %s818_s24 }
  0x5c   : > { %s138_s17 = sshll.u32 %s128_s6, 4  ;;  %s929_s5 = sshll.u32 %s147_s22, 4  ;;  %s139_s17 = int_to_ptr.hbm [resolvable:$true] %s138_s17  ;;  %s159_s5 = int_to_ptr.vmem [resolvable:$true] %s929_s5 }
  0x5d   : > { %s162_s11 = sadd.s32 6, %s818_s24  ;;  %s554_s0 = sshra.s32 %s139_s17, 4  ;;  %s555_s0 = int_to_ptr.hbm [resolvable:$true] %s554_s0 }
  0x5e   : > { %s556_s28 = scalar_lea.hbm %s555_s0, 1  ;;  %p561_p3 = scmp.lt.s32.totalorder %s555_s0, %s1074_s1 }
  0x5f   : > { %p557_p0 = scmp.ne.s32.totalorder %s555_s0, %s556_s28  ;;  %p562_p5 = scmp.lt.s32.totalorder %s852_s26, %s556_s28 }
  0x61   : > { %p558_p1 = pnand %p557_p0, %p403_p6  ;;  %p563_p8 = por %p562_p5, %p561_p3 }
  0x63   : > { %p559_p2 = pneg %p558_p1 }
  0x65   : > { %p564_p9 = pnand %p563_p8, %p559_p2 }
  0x67   : > { %567 = shalt.err (!%p564_p9)  }
  0x68   : > { %378 = dma.hbm_to_vmem [thread:$0]  (%p403_p6), %s139_s17, 16, %s141_s25, [#allocation2 + $0x4] }
  0x69   : > { %s379_s23 = scalar_select %p403_p6, [#allocation4], [#allocation30] }
  0x6a   : > { %s1093_s27 = smov (!%p403_p6, %s144_s27), 0  ;;  %s1095_s11 = smov (!%p403_p6, %s162_s11), 0 }
  0x6b   : > { %s382_s12 = scalar_select %p403_p6, [#allocation4], [#allocation31] }
  0x6c   : > { %s145_s4 = sld [smem:[%s379_s23 + %s1093_s27]]  ;;  %s180_s22 = sadd.s32 7, %s818_s24 }
  0x6d   : > { %s163_s8 = sld [smem:[%s382_s12 + %s1095_s11]]  ;;  %s165_s18 = scalar_lea.vmem %s826_s29, 6 [#allocation5] }
  0x6e   : > { %s385_s9 = scalar_select %p403_p6, [#allocation4], [#allocation32] }
  0x6f   : > { %s1097_s22 = smov (!%p403_p6, %s180_s22), 0  ;;  %s960_s17 = sshll.u32 %s165_s18, 4  ;;  %s177_s17 = int_to_ptr.vmem [resolvable:$true] %s960_s17 }
  0x70   : > { %s962_s27 = sld [smem:[%s385_s9 + %s1097_s22]]  ;;  %s183_s28 = scalar_lea.vmem %s826_s29, 7 [#allocation5] }
  0x72   : > { %s146_s6 = scalar_lea.hbm %s1074_s1, %s145_s4 }
  0x73   : > { %s156_s0 = sshll.u32 %s146_s6, 4  ;;  %s157_s0 = int_to_ptr.hbm [resolvable:$true] %s156_s0 }
  0x74   : > { %s582_s7 = sshra.s32 %s157_s0, 4  ;;  %s583_s7 = int_to_ptr.hbm [resolvable:$true] %s582_s7 }
  0x75   : > { %s584_s11 = scalar_lea.hbm %s583_s7, 1  ;;  %p589_p13 = scmp.lt.s32.totalorder %s583_s7, %s1074_s1 }
  0x76   : > { %p585_p10 = scmp.ne.s32.totalorder %s583_s7, %s584_s11  ;;  %p590_p0 = scmp.lt.s32.totalorder %s852_s26, %s584_s11 }
  0x78   : > { %p586_p11 = pnand %p585_p10, %p403_p6  ;;  %p591_p1 = por %p590_p0, %p589_p13 }
  0x7a   : > { %p587_p12 = pneg %p586_p11 }
  0x7c   : > { %p592_p2 = pnand %p591_p1, %p587_p12 }
  0x7e   : > { %595 = shalt.err (!%p592_p2)  }
  0x7f   : > { %381 = dma.hbm_to_vmem [thread:$0]  (%p403_p6), %s157_s0, 16, %s159_s5, [#allocation2 + $0x5] }
  0x80   : > { %s164_s4 = scalar_lea.hbm %s1074_s1, %s163_s8  ;;  %s977_s18 = sshll.u32 %s183_s28, 4  ;;  %s195_s18 = int_to_ptr.vmem [resolvable:$true] %s977_s18 }
  0x81   : > { %s174_s22 = sshll.u32 %s164_s4, 4  ;;  %s175_s22 = int_to_ptr.hbm [resolvable:$true] %s174_s22 }
  0x82   : > { %s610_s9 = sshra.s32 %s175_s22, 4  ;;  %s611_s9 = int_to_ptr.hbm [resolvable:$true] %s610_s9 }
  0x83   : > { %s612_s25 = scalar_lea.hbm %s611_s9, 1  ;;  %p617_p9 = scmp.lt.s32.totalorder %s611_s9, %s1074_s1 }
  0x84   : > { %p613_p3 = scmp.ne.s32.totalorder %s611_s9, %s612_s25  ;;  %p618_p10 = scmp.lt.s32.totalorder %s852_s26, %s612_s25 }
  0x86   : > { %p614_p5 = pnand %p613_p3, %p403_p6  ;;  %p619_p11 = por %p618_p10, %p617_p9 }
  0x88   : > { %p615_p8 = pneg %p614_p5 }
  0x8a   : > { %p620_p12 = pnand %p619_p11, %p615_p8 }
  0x8c   : > { %623 = shalt.err (!%p620_p12)  }
  0x8d   : > { %384 = dma.hbm_to_vmem [thread:$0]  (%p403_p6), %s175_s22, 16, %s177_s17, [#allocation2 + $0x6] }
  0x8e   : > { %s182_s0 = scalar_lea.hbm %s1074_s1, %s962_s27 }
  0x8f   : > { %s192_s28 = sshll.u32 %s182_s0, 4  ;;  %s193_s28 = int_to_ptr.hbm [resolvable:$true] %s192_s28 }
  0x90   : > { %s638_s7 = sshra.s32 %s193_s28, 4  ;;  %s639_s7 = int_to_ptr.hbm [resolvable:$true] %s638_s7 }
  0x91   : > { %s640_s11 = scalar_lea.hbm %s639_s7, 1  ;;  %p645_p2 = scmp.lt.s32.totalorder %s639_s7, %s1074_s1 }
  0x92   : > { %p641_p13 = scmp.ne.s32.totalorder %s639_s7, %s640_s11  ;;  %p646_p3 = scmp.lt.s32.totalorder %s852_s26, %s640_s11 }
  0x94   : > { %p642_p0 = pnand %p641_p13, %p403_p6  ;;  %p647_p5 = por %p646_p3, %p645_p2 }
  0x96   : > { %p643_p1 = pneg %p642_p0 }
  0x98   : > { %p648_p8 = pnand %p647_p5, %p643_p1 }
  0x9a   : > { %651 = shalt.err (!%p648_p8)  }
  0x9b   : > { %387 = dma.hbm_to_vmem [thread:$0]  (%p403_p6), %s193_s28, 16, %s195_s18, [#allocation2 + $0x7] }
  0x9c   : > { %711 = dma.done.wait (%p403_p6), [#allocation2], 16 }
  0x9d   : > { %713 = vsyncadd (%p403_p6), [#allocation2], 4294967280 }
  0x9e   : > { %715 = dma.done.wait (%p403_p6), [#allocation2 + $0x1], 16 }
  0x9f   : > { %717 = vsyncadd (%p403_p6), [#allocation2 + $0x1], 4294967280 }
  0xa0   : > { %719 = dma.done.wait (%p403_p6), [#allocation2 + $0x2], 16 }
  0xa1   : > { %721 = vsyncadd (%p403_p6), [#allocation2 + $0x2], 4294967280 }
  0xa2   : > { %723 = dma.done.wait (%p403_p6), [#allocation2 + $0x3], 16 }
  0xa3   : > { %725 = vsyncadd (%p403_p6), [#allocation2 + $0x3], 4294967280 }
  0xa4   : > { %727 = dma.done.wait (%p403_p6), [#allocation2 + $0x4], 16 }
  0xa5   : > { %729 = vsyncadd (%p403_p6), [#allocation2 + $0x4], 4294967280 }
  0xa6   : > { %731 = dma.done.wait (%p403_p6), [#allocation2 + $0x5], 16 }
  0xa7   : > { %733 = vsyncadd (%p403_p6), [#allocation2 + $0x5], 4294967280 }
  0xa8   : > { %735 = dma.done.wait (%p403_p6), [#allocation2 + $0x6], 16 }
  0xa9   : > { %737 = vsyncadd (%p403_p6), [#allocation2 + $0x6], 4294967280 }
  0xaa   : > { %739 = dma.done.wait (%p403_p6), [#allocation2 + $0x7], 16 }
  0xab   : > { %741 = vsyncadd (%p403_p6), [#allocation2 + $0x7], 4294967280  ;;  %s233_s27 = scalar_lea.hbm %s1075_s2, %s818_s24  ;;  %p1040_p9 = pnand %p403_p6, %p805_p4 }
  0xac   : > { %s237_s29 = sshll.u32 %s233_s27, 4  ;;  %p404_p10 = scmp.ge.s32.totalorder %s756_s15, 1  ;;  %s238_s29 = int_to_ptr.hbm [resolvable:$true] %s237_s29 }
  0xad   : > { %s1080_s4 = sand.u32 1, %s752_s14   ;;  %p670_p11 = pneg %p1040_p9 }
  0xae   : > { %s223_s22 = scalar_lea.sflag [#allocation6], %s1080_s4  ;;  %s681_s18 = sshra.s32 %s238_s29, 4  ;;  %s682_s18 = int_to_ptr.hbm [resolvable:$true] %s681_s18 }
  0xaf   : > { %s683_s9 = scalar_lea.hbm %s682_s18, 8  ;;  %s688_s25 = scalar_lea.hbm %s1075_s2, 16 }
  0xb0   : > { %p684_p12 = scmp.ne.s32.totalorder %s682_s18, %s683_s9  ;;  %p689_p4 = scmp.lt.s32.totalorder %s682_s18, %s1075_s2 }
  0xb1   : > { %p690_p6 = scmp.lt.s32.totalorder %s688_s25, %s683_s9 }
  0xb2   : > { %p686_p13 = pnand %p684_p12, %p670_p11 }
  0xb3   : > { %p691_p1 = por %p690_p6, %p689_p4 }
  0xb4   : > { %p687_p0 = pneg %p686_p13 }
  0xb6   : > { %p692_p2 = pnand %p691_p1, %p687_p0 }
  0xb8   : > { %695 = shalt.err (!%p692_p2)
}
  0xb9   : > { %398 = dma.vmem_to_hbm [thread:$0]  (!%p1040_p9), %s834_s30, 128, %s238_s29, %s223_s22  }
  0xba   : > { %s249_s5 = sand.u32 1, %s748_s13   ;;  %p400_p3 = pnand %p404_p10, %p810_p7 }
  0xbb   : > { %s250_s8 = scalar_lea.sflag [#allocation6], %s249_s5 }
  0xbc   : > { %p401_p5 = pneg %p400_p3 }
  0xbe   : > { %743 = dma.done.wait (%p401_p5), %s250_s8, 128  }
  0xbf   : > { %745 = vsyncadd (%p401_p5), %s250_s8, 4294967168  ;;  %p20_p8 = scmp.ge.s32.totalorder %s794_s16, 3   ;;  %s1081_s13 = smov %s752_s14 }
  0xc0   : > { %s1082_s14 = smov %s803_s19  ;;  %s1083_s15 = smov %s794_s16 }
  0xc1   :  { %22 = sbr.rel (!%p20_p8) target bundleno = 9 (0x9), region = 105 }
  0xc6   :  { %256 = vsyncpa [#allocation6], 1 }
  0xc7   :  { %258 = vsyncpa [#allocation6 + $0x1], 1 }
  0xc8   :  { %259 = vsyncmov [#allocation2] }
  0xcb   :  { %s260_s15 = vpop.sfrf %259 }
  0xcc   :  { %p353_p7 = scmp.ne.s32.totalorder %s260_s15, 0 }
  0xce   :  { %264 = shalt.err (%p353_p7)  }
  0xcf   :  { %266 = vsyncmov [#allocation2 + $0x1] }
  0xd2   :  { %s267_s21 = vpop.sfrf %266 }
  0xd3   :  { %p354_p9 = scmp.ne.s32.totalorder %s267_s21, 0 }
  0xd5   :  { %271 = shalt.err (%p354_p9)  }
  0xd6   :  { %273 = vsyncmov [#allocation2 + $0x2] }
  0xd9   :  { %s274_s30 = vpop.sfrf %273 }
  0xda   :  { %p355_p10 = scmp.ne.s32.totalorder %s274_s30, 0 }
  0xdc   :  { %278 = shalt.err (%p355_p10)  }
  0xdd   :  { %280 = vsyncmov [#allocation2 + $0x3] }
  0xe0   :  { %s281_s0 = vpop.sfrf %280 }
  0xe1   :  { %p356_p11 = scmp.ne.s32.totalorder %s281_s0, 0 }
  0xe3   :  { %285 = shalt.err (%p356_p11)  }
  0xe4   :  { %287 = vsyncmov [#allocation2 + $0x4] }
  0xe7   :  { %s288_s16 = vpop.sfrf %287 }
  0xe8   :  { %p357_p12 = scmp.ne.s32.totalorder %s288_s16, 0 }
  0xea   :  { %292 = shalt.err (%p357_p12)  }
  0xeb   :  { %294 = vsyncmov [#allocation2 + $0x5] }
  0xee   :  { %s295_s1 = vpop.sfrf %294 }
  0xef   :  { %p358_p13 = scmp.ne.s32.totalorder %s295_s1, 0 }
  0xf1   :  { %299 = shalt.err (%p358_p13)  }
  0xf2   :  { %301 = vsyncmov [#allocation2 + $0x6] }
  0xf5   :  { %s302_s2 = vpop.sfrf %301 }
  0xf6   :  { %p359_p0 = scmp.ne.s32.totalorder %s302_s2, 0 }
  0xf8   :  { %306 = shalt.err (%p359_p0)  }
  0xf9   :  { %308 = vsyncmov [#allocation2 + $0x7] }
  0xfc   :  { %s309_s13 = vpop.sfrf %308 }
  0xfd   :  { %p360_p4 = scmp.ne.s32.totalorder %s309_s13, 0 }
  0xff   :  { %313 = shalt.err (%p360_p4)  }

</bundles_post_ra>
